<compile_context>
chip_gen: v5e
topology: v5e:2x2
jax: 0.10.0
libtpu: 0.0.40
codegen_flags: <defaults>
</compile_context>

<pallas_src>
import functools

import numpy as np
import jax
import jax.numpy as jnp
from jax.experimental import pallas as pl
from jax.experimental.pallas import tpu as pltpu


def _hf_loss_kernel(fake_ref, real_ref, pt_ref, out_ref, *, band_start, band_len):
    nb, cb, H, W = fake_ref.shape
    band_end = band_start + band_len

    acc = jnp.zeros((8, W), dtype=jnp.float32)   # single vreg-shaped accumulator
    extra = jnp.float32(0.0)                     # fallback for non-8-aligned row counts

    def fold(acc, extra, dsq):
        """Fold a (..., W) block of squared errors into the accumulator (vreg adds only)."""
        rows = int(np.prod(dsq.shape[:-1]))
        if rows % 8 == 0:
            return acc + jnp.sum(dsq.reshape(rows // 8, 8, W), axis=0), extra
        return acc, extra + jnp.sum(dsq)

    # ---- band rows: circulant W-projection on the MXU (fake & real fused into one dot) ----
    if band_len > 0:  # static decision (band is known at trace time)
        pt = pt_ref[...]                                             # (W, 2W) f32

        def band_rows(ref):
            # band_start is sublane-aligned for H=64 (rows 8..23): no relayout on the slice,
            # and band_len is a multiple of 8 so the row merge is tile-aligned.
            x = ref[:, :, band_start:band_end, :]                    # (nb, cb, band_len, W)
            return x.reshape(nb * cb * band_len, W)

        half = nb * cb * band_len
        xb = jnp.concatenate([band_rows(fake_ref), band_rows(real_ref)], axis=0)
        y = jnp.dot(xb, pt, preferred_element_type=jnp.float32)      # (2*half, 2W)
        yr = y[:, :W]
        yi = y[:, W:]
        mag = jnp.sqrt(yr * yr + yi * yi)                            # |ifft . mask . fft|
        db = mag[:half] - mag[half:]
        acc, extra = fold(acc, extra, db * db)

    # ---- remaining rows: plain |fake| - |real| elementwise ----
    def plain_sq(h0, h1):
        d = jnp.abs(fake_ref[:, :, h0:h1, :]) - jnp.abs(real_ref[:, :, h0:h1, :])
        return d * d

    if band_start > 0:
        acc, extra = fold(acc, extra, plain_sq(0, band_start))
    if band_end < H:
        acc, extra = fold(acc, extra, plain_sq(band_end, H))

    total = jnp.sum(acc) + extra                                     # ONE cross-lane reduce
    out_ref[...] = total.reshape(1, 1, 1, 1)


def _pick_block(N, C, hw_bytes, budget_bytes=12 << 20):
    """Pick (NB, CB) so that 2 inputs x 2 pipeline buffers stay within budget_bytes."""
    per_buf = max(hw_bytes, budget_bytes // 4)
    cb = 1
    for d in range(1, C + 1):                  # largest divisor of C whose slab fits
        if C % d == 0 and d * hw_bytes <= per_buf:
            cb = d
    nb = 1
    if cb == C:                                # whole images fit -> batch several per step
        img_bytes = C * hw_bytes
        nb_cap = max(1, per_buf // img_bytes)
        if N >= 2:                             # keep the leading grid axis >= 2 (v7x megacore)
            nb_cap = min(nb_cap, N // 2)
        for d in range(1, N + 1):
            if N % d == 0 and d <= nb_cap:
                nb = d
    return nb, cb


def high_freq_loss(fake_nchw, real_nchw):
    """fake/real: (N, C, H, W) float32 -> scalar float32 MSE of high-pass magnitudes."""
    N, C, H, W = fake_nchw.shape

    # ---- static, input-independent setup (numpy, float64) ---------------------------------
    hh = np.arange(H)
    h_in_band = ((hh + H // 2) % H >= 40) & ((hh + H // 2) % H < 56)
    ww = np.arange(W)
    w_in_band = ((ww + W // 2) % W >= 40) & ((ww + W // 2) % W < 56)

    idx = np.nonzero(h_in_band)[0]
    if idx.size and w_in_band.any():
        band_start, band_len = int(idx[0]), int(idx.size)
        # TODO(synk): for H where the shifted band wraps to a non-contiguous row range this
        # kernel would need two band segments; the module's 40:56 block with H=64 is contiguous.
        assert np.array_equal(idx, np.arange(band_start, band_start + band_len)), (
            "shifted H band must map to a contiguous row range")
    else:
        band_start, band_len = 0, 0            # nothing is zeroed -> pure elementwise MSE

    keep = (~w_in_band).astype(np.float64)                     # keep-mask over W-frequencies
    Fw = np.exp(-2j * np.pi * np.outer(ww, ww) / W)            # forward DFT matrix along W
    P = (Fw.conj() @ (keep[:, None] * Fw)) / W                 # ifft . mask . fft (C cancels)
    PT = np.concatenate([P.real.T, P.imag.T], axis=1)          # (W, 2W): x_row @ PT -> [re|im]
    pt = jnp.asarray(PT, dtype=jnp.float32)                    # f32 for accuracy (band is tiny)

    # ---- block / grid selection (VMEM-budgeted, megacore-friendly) ------------------------
    hw_bytes = H * W * 4
    NB, CB = _pick_block(N, C, hw_bytes)
    grid = (N // NB, C // CB)

    block_bytes = NB * CB * hw_bytes
    pt_bytes = int(PT.size * 4)
    vmem_limit = int(min(max(4 * block_bytes + 2 * pt_bytes + (2 << 20), 16 << 20), 48 << 20))

    cost = pl.CostEstimate(
        flops=int(2 * (2 * N * C * band_len * W) * (2 * W)),
        transcendentals=int(2 * N * C * band_len * W),
        bytes_accessed=int(2 * N * C * H * W * 4 + pt_bytes + grid[0] * grid[1] * 4),
    )

    kernel = functools.partial(_hf_loss_kernel, band_start=band_start, band_len=band_len)

    partials = pl.pallas_call(
        kernel,
        out_shape=jax.ShapeDtypeStruct((grid[0], grid[1], 1, 1), jnp.float32),
        grid_spec=pltpu.PrefetchScalarGridSpec(
            num_scalar_prefetch=0,
            grid=grid,
            in_specs=[
                pl.BlockSpec((NB, CB, H, W), lambda n, c: (n, c, 0, 0)),   # fake (NCHW, W=lanes)
                pl.BlockSpec((NB, CB, H, W), lambda n, c: (n, c, 0, 0)),   # real
                pl.BlockSpec((W, 2 * W), lambda n, c: (0, 0)),             # stacked P^T (resident)
            ],
            out_specs=pl.BlockSpec((1, 1, 1, 1), lambda n, c: (n, c, 0, 0)),  # per-step partial
        ),
        compiler_params=pltpu.CompilerParams(
            dimension_semantics=("parallel", "parallel"),
            vmem_limit_bytes=vmem_limit),
        cost_estimate=cost,
    )(fake_nchw, real_nchw, pt)

    return jnp.sum(partials) * (1.0 / float(N * C * H * W))


def reference_numpy(fake, real):
    """Direct numpy transcription of the PyTorch module's forward (float64)."""
    f1 = np.fft.fft2(np.transpose(fake, (0, 2, 3, 1)))
    f2 = np.fft.fft2(np.transpose(real, (0, 2, 3, 1)))
    f1 = np.fft.fftshift(f1)
    f2 = np.fft.fftshift(f2)
    f1[:, 40:56, 40:56, :] = 0
    f2[:, 40:56, 40:56, :] = 0
    f1 = np.abs(np.fft.ifft2(np.fft.ifftshift(f1)))
    f2 = np.abs(np.fft.ifft2(np.fft.ifftshift(f2)))
    return np.mean((f1.astype(np.float32) - f2.astype(np.float32)) ** 2)


if __name__ == "__main__":
    # Spatial size 64 so the hard-coded 40:56 frequency block actually intersects the image.
    N, C, H, W = 2, 4, 64, 64
    key = jax.random.PRNGKey(0)
    k1, k2 = jax.random.split(key)
    fake = jax.random.normal(k1, (N, C, H, W), dtype=jnp.float32)
    real = jax.random.normal(k2, (N, C, H, W), dtype=jnp.float32)

    loss = high_freq_loss(fake, real)
    loss = jax.block_until_ready(loss)

    ref = reference_numpy(np.asarray(fake), np.asarray(real))
    np.testing.assert_allclose(float(loss), float(ref), rtol=5e-2, atol=1e-3)
    print("KERNEL_OK")
</pallas_src>

<mosaic_0001>
module attributes {stable_mosaic.version = 11 : i64} {
  func.func @_hf_loss_kernel(%arg0: i32, %arg1: i32, %arg2: memref<1x4x64x64xf32, #tpu.memory_space<vmem>>, %arg3: memref<1x4x64x64xf32, #tpu.memory_space<vmem>>, %arg4: memref<64x128xf32, #tpu.memory_space<vmem>>, %arg5: memref<1x1x1x1xf32, #tpu.memory_space<vmem>>) attributes {dimension_semantics = [#tpu.dimension_semantics<parallel>, #tpu.dimension_semantics<parallel>], iteration_bounds = array<i64: 2, 1>, scalar_prefetch = 0 : i64, scratch_operands = 0 : i64, tpu.core_type = #tpu.core_type<tc>, window_params = [{transform_indices = @transform_0, window_bounds = array<i64: 1, 4, 64, 64>}, {transform_indices = @transform_1, window_bounds = array<i64: 1, 4, 64, 64>}, {pipeline_mode = #tpu.pipeline_mode<synchronous>, transform_indices = @transform_2, window_bounds = array<i64: 64, 128>}, {transform_indices = @transform_3, window_bounds = array<i64: 1, 1, 1, 1>}]} {
    %cst = arith.constant 0.000000e+00 : f32
    %0 = vector.broadcast %cst : f32 to vector<8x64xf32>
    %c0 = arith.constant 0 : index
    %c0_0 = arith.constant 0 : index
    %1 = vector.load %arg4[%c0, %c0_0] : memref<64x128xf32, #tpu.memory_space<vmem>>, vector<64x128xf32>
    %c0_1 = arith.constant 0 : index
    %c0_2 = arith.constant 0 : index
    %c8 = arith.constant 8 : index
    %c0_3 = arith.constant 0 : index
    %2 = vector.load %arg2[%c0_1, %c0_2, %c8, %c0_3] : memref<1x4x64x64xf32, #tpu.memory_space<vmem>>, vector<1x4x16x64xf32>
    %3 = vector.shape_cast %2 : vector<1x4x16x64xf32> to vector<64x64xf32>
    %c0_4 = arith.constant 0 : index
    %c0_5 = arith.constant 0 : index
    %c8_6 = arith.constant 8 : index
    %c0_7 = arith.constant 0 : index
    %4 = vector.load %arg3[%c0_4, %c0_5, %c8_6, %c0_7] : memref<1x4x64x64xf32, #tpu.memory_space<vmem>>, vector<1x4x16x64xf32>
    %5 = vector.shape_cast %4 : vector<1x4x16x64xf32> to vector<64x64xf32>
    %6 = tpu.concatenate %3, %5 in 0 : vector<64x64xf32>, vector<64x64xf32> -> vector<128x64xf32>
    %cst_8 = arith.constant dense<0.000000e+00> : vector<128x128xf32>
    %7 = tpu.matmul %6, %1, %cst_8 {dimension_numbers = #tpu.dot_dimension_numbers<[1], [0], [0], [1], [0, 0, 1, 1], [], []>} : vector<128x64xf32>, vector<64x128xf32>, vector<128x128xf32> -> vector<128x128xf32>
    %8 = vector.extract_strided_slice %7 {offsets = [0, 0], sizes = [128, 64], strides = [1, 1]} : vector<128x128xf32> to vector<128x64xf32>
    %9 = vector.extract_strided_slice %7 {offsets = [0, 64], sizes = [128, 64], strides = [1, 1]} : vector<128x128xf32> to vector<128x64xf32>
    %10 = arith.mulf %8, %8 : vector<128x64xf32>
    %11 = arith.mulf %9, %9 : vector<128x64xf32>
    %12 = arith.addf %10, %11 : vector<128x64xf32>
    %13 = math.sqrt %12 : vector<128x64xf32>
    %14 = vector.extract_strided_slice %13 {offsets = [0, 0], sizes = [64, 64], strides = [1, 1]} : vector<128x64xf32> to vector<64x64xf32>
    %15 = vector.extract_strided_slice %13 {offsets = [64, 0], sizes = [64, 64], strides = [1, 1]} : vector<128x64xf32> to vector<64x64xf32>
    %16 = arith.subf %14, %15 : vector<64x64xf32>
    %17 = arith.mulf %16, %16 : vector<64x64xf32>
    %18 = vector.shape_cast %17 : vector<64x64xf32> to vector<8x8x64xf32>
    %cst_9 = arith.constant dense<0.000000e+00> : vector<8x64xf32>
    %19 = vector.multi_reduction <add>, %18, %cst_9 [0] : vector<8x8x64xf32> to vector<8x64xf32>
    %20 = arith.addf %0, %19 : vector<8x64xf32>
    %c0_10 = arith.constant 0 : index
    %c0_11 = arith.constant 0 : index
    %c0_12 = arith.constant 0 : index
    %c0_13 = arith.constant 0 : index
    %21 = vector.load %arg2[%c0_10, %c0_11, %c0_12, %c0_13] : memref<1x4x64x64xf32, #tpu.memory_space<vmem>>, vector<1x4x8x64xf32>
    %22 = math.absf %21 : vector<1x4x8x64xf32>
    %c0_14 = arith.constant 0 : index
    %c0_15 = arith.constant 0 : index
    %c0_16 = arith.constant 0 : index
    %c0_17 = arith.constant 0 : index
    %23 = vector.load %arg3[%c0_14, %c0_15, %c0_16, %c0_17] : memref<1x4x64x64xf32, #tpu.memory_space<vmem>>, vector<1x4x8x64xf32>
    %24 = math.absf %23 : vector<1x4x8x64xf32>
    %25 = arith.subf %22, %24 : vector<1x4x8x64xf32>
    %26 = arith.mulf %25, %25 : vector<1x4x8x64xf32>
    %27 = vector.shape_cast %26 : vector<1x4x8x64xf32> to vector<4x8x64xf32>
    %cst_18 = arith.constant dense<0.000000e+00> : vector<8x64xf32>
    %28 = vector.multi_reduction <add>, %27, %cst_18 [0] : vector<4x8x64xf32> to vector<8x64xf32>
    %29 = arith.addf %20, %28 : vector<8x64xf32>
    %c0_19 = arith.constant 0 : index
    %c0_20 = arith.constant 0 : index
    %c24 = arith.constant 24 : index
    %c0_21 = arith.constant 0 : index
    %30 = vector.load %arg2[%c0_19, %c0_20, %c24, %c0_21] : memref<1x4x64x64xf32, #tpu.memory_space<vmem>>, vector<1x4x40x64xf32>
    %31 = math.absf %30 : vector<1x4x40x64xf32>
    %c0_22 = arith.constant 0 : index
    %c0_23 = arith.constant 0 : index
    %c24_24 = arith.constant 24 : index
    %c0_25 = arith.constant 0 : index
    %32 = vector.load %arg3[%c0_22, %c0_23, %c24_24, %c0_25] : memref<1x4x64x64xf32, #tpu.memory_space<vmem>>, vector<1x4x40x64xf32>
    %33 = math.absf %32 : vector<1x4x40x64xf32>
    %34 = arith.subf %31, %33 : vector<1x4x40x64xf32>
    %35 = arith.mulf %34, %34 : vector<1x4x40x64xf32>
    %36 = vector.shape_cast %35 : vector<1x4x40x64xf32> to vector<20x8x64xf32>
    %cst_26 = arith.constant dense<0.000000e+00> : vector<8x64xf32>
    %37 = vector.multi_reduction <add>, %36, %cst_26 [0] : vector<20x8x64xf32> to vector<8x64xf32>
    %38 = arith.addf %29, %37 : vector<8x64xf32>
    %39 = vector.shape_cast %38 : vector<8x64xf32> to vector<1x8x64xf32>
    %cst_27 = arith.constant dense<0.000000e+00> : vector<1xf32>
    %40 = vector.multi_reduction <add>, %39, %cst_27 [1, 2] : vector<1x8x64xf32> to vector<1xf32>
    %41 = vector.shape_cast %40 : vector<1xf32> to vector<1x1x1xf32>
    %42 = vector.extract %41[0, 0, 0] : f32 from vector<1x1x1xf32>
    %cst_28 = arith.constant 0.000000e+00 : f32
    %43 = arith.addf %42, %cst_28 : f32
    %44 = vector.broadcast %43 : f32 to vector<1x1x1x1xf32>
    %c0_29 = arith.constant 0 : index
    %c0_30 = arith.constant 0 : index
    %c0_31 = arith.constant 0 : index
    %c0_32 = arith.constant 0 : index
    %45 = vector.load %arg5[%c0_29, %c0_30, %c0_31, %c0_32] : memref<1x1x1x1xf32, #tpu.memory_space<vmem>>, vector<1x1x1x1xf32>
    tpu.vector_store %arg5[%c0_29, %c0_30, %c0_31, %c0_32], %44 {strides = array<i32>} : memref<1x1x1x1xf32, #tpu.memory_space<vmem>>, vector<1x1x1x1xf32>,
    return
  }
  func.func @transform_0(%arg0: i32, %arg1: i32) -> (i32, i32, i32, i32) {
    %c0_i32 = arith.constant 0 : i32
    %c0_i32_0 = arith.constant 0 : i32
    %c0_i32_1 = arith.constant 0 : i32
    return %arg0, %arg1, %c0_i32, %c0_i32_0 : i32, i32, i32, i32
  }
  func.func @transform_1(%arg0: i32, %arg1: i32) -> (i32, i32, i32, i32) {
    %c0_i32 = arith.constant 0 : i32
    %c0_i32_0 = arith.constant 0 : i32
    %c0_i32_1 = arith.constant 0 : i32
    return %arg0, %arg1, %c0_i32, %c0_i32_0 : i32, i32, i32, i32
  }
  func.func @transform_2(%arg0: i32, %arg1: i32) -> (i32, i32) {
    %c0_i32 = arith.constant 0 : i32
    %c0_i32_0 = arith.constant 0 : i32
    %c0_i32_1 = arith.constant 0 : i32
    return %c0_i32, %c0_i32_0 : i32, i32
  }
  func.func @transform_3(%arg0: i32, %arg1: i32) -> (i32, i32, i32, i32) {
    %c0_i32 = arith.constant 0 : i32
    %c0_i32_0 = arith.constant 0 : i32
    %c0_i32_1 = arith.constant 0 : i32
    return %arg0, %arg1, %c0_i32, %c0_i32_0 : i32, i32, i32, i32
  }
}

</mosaic_0001>

<bundles_post_ra>
// kernel: tpu_custom_call.1
= control target key start
LH: loop header
LB: loop body
LE: loop exit
PB: predicated region body
PF: predicated region fallthrough
CT: control target
= control target key end

     0   :  { %s2023_s0 = inlined_call_operand.hbm [shape: f32[2,4,64,64], index: 0, kind: input, shape index: {}]   ;;  %s2024_s1 = inlined_call_operand.hbm [shape: f32[2,4,64,64], index: 1, kind: input, shape index: {}]   ;;  %s2025_s2 = inlined_call_operand.hbm [shape: f32[64,128], index: 2, kind: input, shape index: {}]   ;;  %s2026_s3 = inlined_call_operand.vmem [shape: f32[2,1,1,1], index: 3, kind: output, shape index: {}]  }
   0x1   :  { %2032 = sst [smem:[#allocation10_spill]] %s2025_s2 }
   0x2   :  { %8 = vsyncpa [#allocation3], 0 }
   0x3   :  { %10 = vsyncpa [#allocation3 + $0x1], 0 }
   0x4   :  { %11 = vsyncpa [#allocation5], 0 }
   0x5   :  { %13 = vsyncpa [#allocation5 + $0x1], 0  ;;  %s1399_s12 = smov 0   ;;  %s1401_s13 = smov 0  }
   0x6   :  { %s1403_s14 = smov 0   ;;  %s1405_s15 = smov 0  }
   0x7   :  { %s1407_s16 = smov 0   ;;  %s1409_s17 = smov 0  }
   0x8 LB: > { %s2027_s18 = sadd.s32 4294967295, %s1373_s17   ;;  %p53_p0 = scmp.ne.s32.totalorder %s1357_s13, %s1353_s12  ;;  %s1373_s17 = sphi %s1409_s17, %s19_s17   ;;  %s1369_s16 = sphi %s1407_s16, %s2045_s16   ;;  %s1365_s15 = sphi %s1405_s15, %s2044_s15   ;;  %s1361_s14 = sphi %s1403_s14, %s2043_s14   ;;  %s1357_s13 = sphi %s1401_s13, %s2042_s13   ;;  %s1353_s12 = sphi %s1399_s12, %s2041_s12  }
   0x9   : > { %p1431_p1 = scmp.eq.s32.totalorder %s2027_s18, 0  ;;  %p1060_p2 = scmp.ge.s32.totalorder %s1373_s17, 1 }
   0xa   : > { %p141_p3 = scmp.lt.s32.totalorder %s1373_s17, 3  ;;  %s2035_s2 = sld [smem:[#allocation10_spill]] }
   0xb   : > { %p1439_p4 = por %p1431_p1, %p53_p0  ;;  %s1375_s25 = smov [#allocation6]  }
   0xc   : > { %p1446_p5 = pnand %p1060_p2, %p141_p3  ;;  %s154_s26 = sshll.u32 %s1375_s25, 4  ;;  %s155_s26 = int_to_ptr.vmem [resolvable:$true] %s154_s26 }
   0xd   : > { %s2028_s27 = smov 128   ;;  %s2030_s28 = smov 8  }
   0xe   : > { %p1127_p6 = pneg %p1446_p5  ;;  %s31_s29 = sadd.s32 1, %s1369_s16 }
   0xf   : > { %p33_p8 = scmp.ge.s32.totalorder %s31_s29, 2  ;;  %s40_s30 = sadd.s32 1, %s1361_s14 }
  0x10   : > { %s152_s23 = sshll.u32 %s2035_s2, 4  ;;  %p1128_p7 = pnand %p1127_p6, %p1431_p1  ;;  %s153_s23 = int_to_ptr.hbm [resolvable:$true] %s152_s23 }
  0x11   : > { %p47_p9 = scmp.ne.s32.totalorder %s1361_s14, %s1357_s13  ;;  %p48_p10 = scmp.eq.s32.totalorder %s1373_s17, 0 }
  0x12   : > { %1130 = dma.hbm_to_vmem [thread:$0]  (!%p1128_p7), %s153_s23, 1024, %s155_s26, [#allocation5], %s2028_s27, %s2028_s27, %s2030_s28  }
  0x13   : > { %s2047_s29 = smov (%p33_p8, %s31_s29), 0  ;;  %p1464_p11 = por %p48_p10, %p47_p9 }
  0x14   : > { %p1139_p12 = scmp.lt.s32.totalorder %s1373_s17, 2  ;;  %s35_s5 = ssub.s32 %s1369_s16, %s2047_s29 }
  0x15   : > { %s168_s6 = sand.u32 1, %s1361_s14   ;;  %p38_p13 = scmp.eq.s32.totalorder %s35_s5, 0 }
  0x16   : > { %s1063_s7 = sshll.u32 %s168_s6, 8  ;;  %s1091_s8 = sshll.u32 %s1369_s16, 8 }
  0x17   : > { %s1474_s9 = scalar_select %p38_p13, %s1361_s14, %s40_s30  }
  0x18   : > { %s180_s12 = scalar_lea.hbm %s2023_s0, %s1091_s8  ;;  %s172_s22 = scalar_lea.vmem [#allocation2], %s1063_s7 }
  0x19   : > { %s181_s21 = sshll.u32 %s180_s12, 4  ;;  %s183_s23 = sshll.u32 %s172_s22, 4  ;;  %s182_s21 = int_to_ptr.hbm [resolvable:$true] %s181_s21  ;;  %s184_s23 = int_to_ptr.vmem [resolvable:$true] %s183_s23 }
  0x1a   : > { %p1132_p0 = pnand %p1139_p12, %p1464_p11  ;;  %s205_s5 = scalar_lea.hbm %s2024_s1, %s1091_s8 }
  0x1b   : > { %s197_s18 = scalar_lea.vmem [#allocation4], %s1063_s7  ;;  %s206_s27 = sshll.u32 %s205_s5, 4  ;;  %s207_s27 = int_to_ptr.hbm [resolvable:$true] %s206_s27 }
  0x1c   : > { %s208_s30 = sshll.u32 %s197_s18, 4  ;;  %s169_s28 = scalar_lea.sflag [#allocation3], %s168_s6  ;;  %s209_s30 = int_to_ptr.vmem [resolvable:$true] %s208_s30 }
  0x1d   : > { %s2038_s2 = smov 8   ;;  %s2039_s10 = smov 128  }
  0x1e   : > { %1134 = dma.hbm_to_vmem [thread:$0]  (!%p1132_p0), %s182_s21, 4096, %s184_s23, %s169_s28, %s2039_s10, %s2039_s10, %s2038_s2  }
  0x1f   : > { %s193_s11 = sand.u32 1, %s1373_s17   ;;  %220 = sbr.rel (%p1446_p5) target bundleno = 604 (0x25c), region = 32 }
  0x20   : > { %s194_s12 = scalar_lea.sflag [#allocation5], %s193_s11  ;;  %s222_s18 = sand.u32 (!%p1446_p5), 1, %s1357_s13  }
  0x21   : > { %1137 = dma.hbm_to_vmem [thread:$0]  (!%p1132_p0), %s207_s27, 4096, %s209_s30, %s194_s12, %s2039_s10, %s2039_s10, %s2038_s2  }
  0x22   : > { %s1070_s4 = sshll.u32 (!%p1446_p5), %s222_s18, 8  ;;  %s223_s6 = scalar_lea.sflag (!%p1446_p5), [#allocation3], %s222_s18 }
  0x23   : > { %s1496_s7 = scalar_lea.vmem (!%p1446_p5), [#allocation2], %s1070_s4 }
  0x24   : > { %1340 = dma.done.wait (%p1439_p4), %s223_s6, 4096  }
  0x25   : > { %1342 = vsyncadd (%p1439_p4), %s223_s6, 4294963200  ;;  %s2040_s28 = sadd.s32 4294967295, %s1373_s17   ;;  %s1504_s27 = scalar_lea.vmem [#allocation4], %s1070_s4 }
  0x26   : > { %s232_s8 = sand.u32 1, %s2040_s28  }
  0x27   : > { %s233_s2 = scalar_lea.sflag [#allocation5], %s232_s8 }
  0x28   : > { %1344 = dma.done.wait (%p1439_p4), %s233_s2, 4096  }
  0x29   : > { %1346 = vsyncadd (%p1439_p4), %s233_s2, 4294963200 }
  0x2a   : > { %1348 = dma.done.wait (%p1431_p1), [#allocation5], 1024  }
  0x2b   : > { %1350 = vsyncadd (%p1431_p1), [#allocation5], 4294966272  ;;  %v286_v0 = vld [vmem:[#allocation6 + $0x38] sm:$0xff]  ;;  %v285_v1 = vld [vmem:[#allocation6 + $0x30] sm:$0xff]  ;;  %vm303_vm0 = vcmask 523264   ;;  %s1378_s19 = smov 64  }
  0x2c   : > { %360 = vmatpush.msra.mxu0 %v286_v0  ;;  %1093 = vmatpush.msra.mxu1 %v286_v0  ;;  %v284_v2 = vld [vmem:[#allocation6 + $0x28] sm:$0xff]  ;;  %v283_v3 = vld [vmem:[#allocation6 + $0x20] sm:$0xff]  ;;  %v282_v4 = vld [vmem:[#allocation6 + $0x18] sm:$0xff]  ;;  %p273_p1 = scmp.lt.s32.totalorder %s1365_s15, 1 }
  0x2d   : > { %1094 = vmatpush.msra.mxu2 %v286_v0  ;;  %1095 = vmatpush.msra.mxu3 %v286_v0  ;;  %v281_v5 = vld [vmem:[#allocation6 + $0x10] sm:$0xff]  ;;  %v280_v6 = vld [vmem:[#allocation6 + $0x8] sm:$0xff]  ;;  %v279_v7 = vld [vmem:[#allocation6] sm:$0xff] }
  0x2e   : > { %361 = vmatpush.msra.mxu0 %v285_v1  ;;  %1096 = vmatpush.msra.mxu1 %v285_v1  ;;  %v287_v8 = vld [vmem:[%s1496_s7 + $0x8] sm:$0xff]  ;;  %v288_v12 = vld [vmem:[%s1496_s7 + $0x10] sm:$0xff]  ;;  %s2049_s15 = smov (!%p273_p1, %s1365_s15), 1 }
  0x2f   : > { %1097 = vmatpush.msra.mxu2 %v285_v1  ;;  %1098 = vmatpush.msra.mxu3 %v285_v1  ;;  %v291_v9 = vld [vmem:[%s1496_s7 + $0x88] sm:$0xff]  ;;  %v296_v13 = vld [vmem:[%s1504_s27 + $0x10] sm:$0xff]  ;;  %s278_s21 = scalar_lea.vmem %s2026_s3, %s2049_s15 }
  0x30   : > { %362 = vmatpush.msra.mxu0 %v284_v2  ;;  %1099 = vmatpush.msra.mxu1 %v284_v2  ;;  %v295_v10 = vld [vmem:[%s1504_s27 + $0x8] sm:$0xff]  ;;  %v292_v14 = vld [vmem:[%s1496_s7 + $0x90] sm:$0xff] }
  0x31   : > { %1100 = vmatpush.msra.mxu2 %v284_v2  ;;  %1101 = vmatpush.msra.mxu3 %v284_v2  ;;  %v299_v11 = vld [vmem:[%s1504_s27 + $0x88] sm:$0xff]  ;;  %v300_v15 = vld [vmem:[%s1504_s27 + $0x90] sm:$0xff] }
  0x32   : > { %363 = vmatpush.msra.mxu0 %v283_v3  ;;  %1102 = vmatpush.msra.mxu1 %v283_v3  ;;  %v289_v16 = vld [vmem:[%s1496_s7 + $0x48] sm:$0xff]  ;;  %v290_v20 = vld [vmem:[%s1496_s7 + $0x50] sm:$0xff] }
  0x33   : > { %1103 = vmatpush.msra.mxu2 %v283_v3  ;;  %1104 = vmatpush.msra.mxu3 %v283_v3  ;;  %v297_v17 = vld [vmem:[%s1504_s27 + $0x48] sm:$0xff]  ;;  %v298_v21 = vld [vmem:[%s1504_s27 + $0x50] sm:$0xff] }
  0x34   : > { %364 = vmatpush.msra.mxu0 %v282_v4  ;;  %1105 = vmatpush.msra.mxu1 %v282_v4  ;;  %v293_v18 = vld [vmem:[%s1496_s7 + $0xc8] sm:$0xff]  ;;  %v294_v22 = vld [vmem:[%s1496_s7 + $0xd0] sm:$0xff] }
  0x35   : > { %1106 = vmatpush.msra.mxu2 %v282_v4  ;;  %1107 = vmatpush.msra.mxu3 %v282_v4  ;;  %v301_v19 = vld [vmem:[%s1504_s27 + $0xc8] sm:$0xff]  ;;  %v302_v23 = vld [vmem:[%s1504_s27 + $0xd0] sm:$0xff] }
  0x36   : > { %365 = vmatpush.msra.mxu0 %v281_v5  ;;  %1108 = vmatpush.msra.mxu1 %v281_v5 }
  0x37   : > { %1109 = vmatpush.msra.mxu2 %v281_v5  ;;  %1110 = vmatpush.msra.mxu3 %v281_v5 }
  0x38   : > { %366 = vmatpush.msra.mxu0 %v280_v6  ;;  %1111 = vmatpush.msra.mxu1 %v280_v6 }
  0x39   : > { %1112 = vmatpush.msra.mxu2 %v280_v6  ;;  %1113 = vmatpush.msra.mxu3 %v280_v6 }
  0x3a   : > { %367 = vmatpush.msra.mxu0 %v279_v7  ;;  %1114 = vmatpush.msra.mxu1 %v279_v7 }
  0x3b   : > { %1115 = vmatpush.msra.mxu2 %v279_v7  ;;  %1073 = vmatmul.msk.f32.vlgmr.msra.gmra.mxu0 %vm303_vm0, %v287_v8 }
  0x3c   : > { %1077 = vmatmul.msk.f32.vlgmr.msra.gmra.mxu1 %vm303_vm0, %v291_v9  ;;  %1081 = vmatmul.msk.f32.vlgmr.msra.gmra.mxu2 %vm303_vm0, %v295_v10 }
  0x3d   : > { %1116 = vmatpush.msra.mxu3 %v279_v7 }
  0x3e   : > { %1085 = vmatmul.msk.f32.vlgmr.msra.gmra.mxu3 %vm303_vm0, %v299_v11 }
  0x43   : > { %1074 = vmatmul.msk.f32.gmra.mxu0 %vm303_vm0, %v288_v12 }
  0x44   : > { %1082 = vmatmul.msk.f32.gmra.mxu2 %vm303_vm0, %v296_v13  ;;  %1078 = vmatmul.msk.f32.gmra.mxu1 %vm303_vm0, %v292_v14 }
  0x46   : > { %1086 = vmatmul.msk.f32.gmra.mxu3 %vm303_vm0, %v300_v15 }
  0x4b   : > { %1075 = vmatmul.msk.f32.gmra.mxu0 %vm303_vm0, %v289_v16 }
  0x4c   : > { %1083 = vmatmul.msk.f32.gmra.mxu2 %vm303_vm0, %v297_v17  ;;  %1079 = vmatmul.msk.f32.gmra.mxu1 %vm303_vm0, %v293_v18 }
  0x4e   : > { %1087 = vmatmul.msk.f32.gmra.mxu3 %vm303_vm0, %v301_v19 }
  0x53   : > { %1076 = vmatmul.msk.f32.gmra.mxu0 %vm303_vm0, %v290_v20 }
  0x54   : > { %1084 = vmatmul.msk.f32.gmra.mxu2 %vm303_vm0, %v298_v21  ;;  %1080 = vmatmul.msk.f32.gmra.mxu1 %vm303_vm0, %v294_v22 }
  0x56   : > { %1088 = vmatmul.msk.f32.gmra.mxu3 %vm303_vm0, %v302_v23 }
  0xb8   : > { %v369_v24 = vpop.f32.mrf.mxu0 }
  0xb9   : > { %v417_v25 = vmul.f32 %v369_v24, %v369_v24  ;;  %v381_v26 = vpop.f32.mrf.mxu1 }
  0xba   : > { %v421_v27 = vmul.f32 %v381_v26, %v381_v26 }
  0xbb   : > { %449 = vrot.lane.b32.xlu0 %v417_v25, %s1378_s19 }
  0xbc   : > { %457 = vrot.lane.b32.xlu2 %v421_v27, %s1378_s19 }
  0xbf   : > { %v393_v28 = vpop.f32.mrf.mxu2 }
  0xc0   : > { %v425_v29 = vmul.f32 %v393_v28, %v393_v28  ;;  %v372_v30 = vpop.f32.mrf.mxu0 }
  0xc1   : > { %v405_v31 = vpop.f32.mrf.mxu3  ;;  %v384_v33 = vpop.f32.mrf.mxu1  ;;  %v418_v36 = vmul.f32 %v372_v30, %v372_v30 }
  0xc2   : > { %v1548_v32 = vmul.f32 %v405_v31, %v405_v31  ;;  %465 = vrot.lane.b32.xlu1 %v425_v29, %s1378_s19  ;;  %v1553_v34 = vmul.f32 %v384_v33, %v384_v33 }
  0xc4   : > { %473 = vrot.lane.b32.xlu0 %v1548_v32, %s1378_s19 }
  0xc7   : > { %v396_v35 = vpop.f32.mrf.mxu2 }
  0xc8   : > { %v375_v37 = vpop.f32.mrf.mxu0  ;;  %v426_v42 = vmul.f32 %v396_v35, %v396_v35 }
  0xc9   : > { %v419_v38 = vmul.f32 %v375_v37, %v375_v37  ;;  %v408_v39 = vpop.f32.mrf.mxu3  ;;  %v387_v40 = vpop.f32.mrf.mxu1 }
  0xca   : > { %459 = vrot.lane.b32.xlu1 %v1553_v34, %s1378_s19  ;;  %v1559_v43 = vmul.f32 %v387_v40, %v387_v40  ;;  %v430_v50 = vmul.f32 %v408_v39, %v408_v39 }
  0xcb   : > { %453 = vrot.lane.b32.xlu2 %v419_v38, %s1378_s19 }
  0xcc   : > { %451 = vrot.lane.b32.xlu0 %v418_v36, %s1378_s19 }
  0xcf   : > { %v399_v41 = vpop.f32.mrf.mxu2 }
  0xd0   : > { %v427_v44 = vmul.f32 %v399_v41, %v399_v41  ;;  %v378_v46 = vpop.f32.mrf.mxu0 }
  0xd1   : > { %v411_v45 = vpop.f32.mrf.mxu3  ;;  %v1567_v49 = vmul.f32 %v378_v46, %v378_v46  ;;  %v390_v51 = vpop.f32.mrf.mxu1 }
  0xd2   : > { %467 = vrot.lane.b32.xlu1 %v426_v42, %s1378_s19  ;;  %v424_v53 = vmul.f32 %v390_v51, %v390_v51  ;;  %v1574_v54 = vmul.f32 %v411_v45, %v411_v45 }
  0xd3   : > { %469 = vrot.lane.b32.xlu2 %v427_v44, %s1378_s19 }
  0xd4   : > { %461 = vrot.lane.b32.xlu0 %v1559_v43, %s1378_s19 }
  0xd7   : > { %v402_v47 = vpop.f32.mrf.mxu2 }
  0xd8   : > { %v1565_v48 = vmul.f32 %v402_v47, %v402_v47 }
  0xd9   : > { %v414_v52 = vpop.f32.mrf.mxu3 }
  0xda   : > { %471 = vrot.lane.b32.xlu1 %v1565_v48, %s1378_s19  ;;  %v1576_v55 = vmul.f32 %v414_v52, %v414_v52 }
  0xdb   : > { %475 = vrot.lane.b32.xlu2 %v430_v50, %s1378_s19 }
  0xdc   : > { %455 = vrot.lane.b32.xlu0 %v1567_v49, %s1378_s19 }
  0xe2   : > { %477 = vrot.lane.b32.xlu1 %v1574_v54, %s1378_s19 }
  0xe3   : > { %463 = vrot.lane.b32.xlu2 %v424_v53, %s1378_s19 }
  0xe4   : > { %479 = vrot.lane.b32.xlu0 %v1576_v55, %s1378_s19 }
 0x116   : > { %v458_v56 = vpop.permute.xlu2 %457 }
 0x117   : > { %v1583_v59 = vadd.f32 %v458_v56, %v421_v27 }
 0x119   : > { %1193 = vrsqrt.f32 %v1583_v59  ;;  %vm568_vm1 = vcmp.eq.f32.partialorder %v1583_v59, inf  ;;  %vm570_vm2 = vcmp.eq.f32.partialorder %v1583_v59, 0.0 }
 0x11f   : > { %v1194_v1 = vpop.eup %1193 }
 0x120   : > { %v562_v4 = vmul.f32 %v1194_v1, %v1583_v59 }
 0x122   : > { %v563_v8 = vmul.f32 %v1194_v1, %v562_v4 }
 0x124   : > { %v564_v14 = vmul.f32 0.5, %v563_v8 }
 0x125   : > { %v454_v57 = vpop.permute.xlu2 %453 }
 0x126   : > { %v1586_v62 = vadd.f32 %v454_v57, %v419_v38 }
 0x128   : > { %1195 = vrsqrt.f32 %v1586_v62  ;;  %vm544_vm3 = vcmp.eq.f32.partialorder %v1586_v62, inf  ;;  %vm546_vm4 = vcmp.eq.f32.partialorder %v1586_v62, 0.0 }
 0x12d   : > { %v450_v58 = vpop.permute.xlu0 %449  ;;  %v470_v63 = vpop.permute.xlu2 %469 }
 0x12e   : > { %v1589_v3 = vadd.f32 %v450_v58, %v417_v25  ;;  %v1196_v5 = vpop.eup %1195  ;;  %v1592_v7 = vadd.f32 %v470_v63, %v427_v44  ;;  %v565_v25 = vsub.f32 1.5, %v564_v14  ;;  %v571_v58 = vand.u32 2147483648, %v1583_v59 }
 0x12f   : > { %v538_v9 = vmul.f32 %v1196_v5, %v1586_v62 }
 0x130   : > { %1197 = vrsqrt.f32 %v1589_v3  ;;  %v566_v35 = vmul.f32 %v1194_v1, %v565_v25  ;;  %vm520_vm5 = vcmp.eq.f32.partialorder %v1589_v3, inf  ;;  %vm640_vm6 = vcmp.eq.f32.partialorder %v1592_v7, inf }
 0x131   : > { %1199 = vrsqrt.f32 %v1592_v7  ;;  %v539_v15 = vmul.f32 %v1196_v5, %v538_v9  ;;  %vm642_vm10 = vcmp.eq.f32.partialorder %v1592_v7, 0.0  ;;  %vm522_vm11 = vcmp.eq.f32.partialorder %v1589_v3, 0.0 }
 0x132   : > { %v567_v47 = vmul.f32 %v566_v35, %v1583_v59 }
 0x133   : > { %v540_v23 = vmul.f32 0.5, %v539_v15 }
 0x134   : > { %v466_v60 = vpop.permute.xlu1 %465 }
 0x135   : > { %v476_v6 = vpop.permute.xlu2 %475  ;;  %v1596_v10 = vadd.f32 %v466_v60, %v425_v29  ;;  %v541_v31 = vsub.f32 1.5, %v540_v23 }
 0x136   : > { %v474_v61 = vpop.permute.xlu0 %473  ;;  %v1608_v18 = vpop.eup %1197  ;;  %v1614_v20 = vadd.f32 %v476_v6, %v430_v50 }
 0x137   : > { %v1606_v16 = vadd.f32 %v474_v61, %v1548_v32  ;;  %v1616_v22 = vpop.eup %1199  ;;  %v514_v24 = vmul.f32 %v1608_v18, %v1589_v3  ;;  %v542_v45 = vmul.f32 %v1196_v5, %v541_v31  ;;  %v547_v5 = vand.u32 2147483648, %v1586_v62 }
 0x138   : > { %v634_v30 = vmul.f32 %v1616_v22, %v1592_v7  ;;  %vm616_vm7 = vcmp.eq.f32.partialorder %v1596_v10, inf  ;;  %vm618_vm9 = vcmp.eq.f32.partialorder %v1596_v10, 0.0 }
 0x139   : > { %v515_v32 = vmul.f32 %v1608_v18, %v514_v24  ;;  %v543_v61 = vmul.f32 %v542_v45, %v1586_v62  ;;  %vm664_vm13 = vcmp.eq.f32.partialorder %v1606_v16, inf }
 0x13a   : > { %v635_v41 = vmul.f32 %v1616_v22, %v634_v30 }
 0x13b   : > { %v516_v46 = vmul.f32 0.5, %v515_v32  ;;  %v545_v31 = vsel %vm544_vm3, %v1586_v62, %v543_v61  ;;  %v643_v32 = vand.u32 2147483648, %v1592_v7 }
 0x13c   : > { %v460_v0 = vpop.permute.xlu1 %459  ;;  %v636_v56 = vmul.f32 0.5, %v635_v41  ;;  %v667_v41 = vand.u32 2147483648, %v1606_v16 }
 0x13d   : > { %v1612_v19 = vadd.f32 %v460_v0, %v1553_v34  ;;  %v464_v21 = vpop.permute.xlu2 %463  ;;  %v569_v0 = vsel %vm568_vm1, %v1583_v59, %v567_v47  ;;  %v517_v1 = vsub.f32 1.5, %v516_v46  ;;  %v1715_v47 = vsel %vm546_vm4, %v547_v5, %v545_v31 }
 0x13e   : > { %v452_v2 = vpop.permute.xlu0 %451  ;;  %v1626_v28 = vadd.f32 %v464_v21, %v424_v53  ;;  %v637_v9 = vsub.f32 1.5, %v636_v56  ;;  %v679_v56 = vand.u32 2147483648, %v1614_v20  ;;  %vm666_vm1 = vcmp.eq.f32.partialorder %v1606_v16, 0.0 }
 0x13f   : > { %v1598_v12 = vadd.f32 %v452_v2, %v418_v36  ;;  %v518_v25 = vmul.f32 %v1608_v18, %v517_v1  ;;  %vm580_vm15 = vcmp.eq.f32.partialorder %v1612_v19, inf  ;;  %vm582_vm3 = vcmp.eq.f32.partialorder %v1612_v19, 0.0 }
 0x141   : > { %vm532_vm8 = vcmp.eq.f32.partialorder %v1598_v12, inf  ;;  %vm534_vm12 = vcmp.eq.f32.partialorder %v1598_v12, 0.0 }
 0x144   : > { %v468_v11 = vpop.permute.xlu1 %467 }
 0x145   : > { %v1600_v13 = vadd.f32 %v468_v11, %v426_v42  ;;  %v1685_v11 = vsel %vm570_vm2, %v571_v58, %v569_v0  ;;  %vm676_vm2 = vcmp.eq.f32.partialorder %v1614_v20, inf }
 0x146   : > { %v462_v17 = vpop.permute.xlu0 %461 }
 0x147   : > { %1201 = vrsqrt.f32 %v1600_v13  ;;  %v1639_v37 = vadd.f32 %v462_v17, %v1559_v43  ;;  %v523_v17 = vand.u32 2147483648, %v1589_v3  ;;  %vm628_vm14 = vcmp.eq.f32.partialorder %v1600_v13, inf }
 0x148   : > { %1203 = vrsqrt.f32 %v1596_v10  ;;  %vm630_vm4 = vcmp.eq.f32.partialorder %v1600_v13, 0.0 }
 0x149   : > { %1205 = vrsqrt.f32 %v1598_v12 }
 0x14a   : > { %1207 = vrsqrt.f32 %v1606_v16 }
 0x14b   : > { %1209 = vrsqrt.f32 %v1612_v19 }
 0x14c   : > { %1211 = vrsqrt.f32 %v1614_v20  ;;  %v472_v34 = vpop.permute.xlu1 %471 }
 0x14d   : > { %v1621_v26 = vpop.eup %1201  ;;  %1213 = vrsqrt.f32 %v1626_v28  ;;  %v1648_v42 = vadd.f32 %v472_v34, %v1565_v48 }
 0x14e   : > { %v1623_v27 = vpop.eup %1203  ;;  %v622_v33 = vmul.f32 %v1621_v26, %v1600_v13  ;;  %v456_v40 = vpop.permute.xlu0 %455  ;;  %1215 = vrsqrt.f32 %v1639_v37 }
 0x14f   : > { %v1628_v29 = vpop.eup %1205  ;;  %v610_v36 = vmul.f32 %v1623_v27, %v1596_v10  ;;  %v1661_v48 = vadd.f32 %v456_v40, %v1567_v49  ;;  %1217 = vrsqrt.f32 %v1648_v42 }
 0x150   : > { %v1641_v38 = vpop.eup %1207  ;;  %v526_v39 = vmul.f32 %v1628_v29, %v1598_v12  ;;  %v623_v43 = vmul.f32 %v1621_v26, %v622_v33  ;;  %v619_v33 = vand.u32 2147483648, %v1596_v10 }
 0x151   : > { %v1650_v44 = vpop.eup %1209  ;;  %v611_v51 = vmul.f32 %v1623_v27, %v610_v36  ;;  %v658_v52 = vmul.f32 %v1641_v38, %v1606_v16  ;;  %1219 = vrsqrt.f32 %v1661_v48 }
 0x152   : > { %v1654_v50 = vpop.eup %1211  ;;  %v527_v53 = vmul.f32 %v1628_v29, %v526_v39  ;;  %v574_v57 = vmul.f32 %v1650_v44, %v1612_v19  ;;  %v624_v63 = vmul.f32 0.5, %v623_v43  ;;  %v638_v39 = vmul.f32 %v1616_v22, %v637_v9 }
 0x153   : > { %v1670_v60 = vpop.eup %1213  ;;  %v670_v49 = vmul.f32 %v1654_v50, %v1614_v20  ;;  %v612_v2 = vmul.f32 0.5, %v611_v51  ;;  %v659_v4 = vmul.f32 %v1641_v38, %v658_v52  ;;  %v519_v51 = vmul.f32 %v518_v25, %v1589_v3 }
 0x154   : > { %v528_v6 = vmul.f32 0.5, %v527_v53  ;;  %v1681_v8 = vpop.eup %1215  ;;  %v575_v14 = vmul.f32 %v1650_v44, %v574_v57  ;;  %v598_v15 = vmul.f32 %v1670_v60, %v1626_v28  ;;  %v625_v21 = vsub.f32 1.5, %v624_v63  ;;  %v478_v43 = vpop.permute.xlu1 %477 }
 0x155   : > { %v671_v23 = vmul.f32 %v1654_v50, %v670_v49  ;;  %v1693_v24 = vpop.eup %1217  ;;  %v613_v30 = vsub.f32 1.5, %v612_v2  ;;  %v660_v59 = vmul.f32 0.5, %v659_v4  ;;  %v586_v35 = vmul.f32 %v1681_v8, %v1639_v37 }
 0x156   : > { %v529_v34 = vsub.f32 1.5, %v528_v6  ;;  %v576_v40 = vmul.f32 0.5, %v575_v14  ;;  %v599_v18 = vmul.f32 %v1670_v60, %v598_v15  ;;  %v626_v45 = vmul.f32 %v1621_v26, %v625_v21  ;;  %v480_v0 = vpop.permute.xlu0 %479 }
 0x157   : > { %v1703_v36 = vpop.eup %1219  ;;  %v646_v46 = vmul.f32 %v1693_v24, %v1648_v42  ;;  %v672_v22 = vmul.f32 0.5, %v671_v23  ;;  %v614_v52 = vmul.f32 %v1623_v27, %v613_v30  ;;  %v661_v53 = vsub.f32 1.5, %v660_v59 }
 0x158   : > { %v530_v57 = vmul.f32 %v1628_v29, %v529_v34  ;;  %v550_v26 = vmul.f32 %v1703_v36, %v1661_v48  ;;  %v587_v58 = vmul.f32 %v1681_v8, %v586_v35  ;;  %v639_v62 = vmul.f32 %v638_v39, %v1592_v7 }
 0x159   : > { %v1728_v61 = vadd.f32 %v478_v43, %v1574_v54  ;;  %v577_v27 = vsub.f32 1.5, %v576_v40  ;;  %v600_v49 = vmul.f32 0.5, %v599_v18  ;;  %v627_v29 = vmul.f32 %v626_v45, %v1600_v13 }
 0x15a   : > { %v647_v63 = vmul.f32 %v1693_v24, %v646_v46  ;;  %v673_v1 = vsub.f32 1.5, %v672_v22  ;;  %v521_v54 = vsel %vm520_vm5, %v1589_v3, %v519_v51  ;;  %v615_v2 = vmul.f32 %v614_v52, %v1596_v10 }
 0x15b   : > { %v535_v4 = vand.u32 2147483648, %v1598_v12  ;;  %v662_v5 = vmul.f32 %v1641_v38, %v661_v53  ;;  %v531_v6 = vmul.f32 %v530_v57, %v1598_v12  ;;  %v551_v9 = vmul.f32 %v1703_v36, %v550_v26 }
 0x15c   : > { %v588_v14 = vmul.f32 0.5, %v587_v58  ;;  %1221 = vrsqrt.f32 %v1728_v61  ;;  %v1748_v15 = vadd.f32 %v480_v0, %v1576_v55  ;;  %v578_v21 = vmul.f32 %v1650_v44, %v577_v27 }
 0x15d   : > { %v601_v23 = vsub.f32 1.5, %v600_v49  ;;  %v629_v38 = vsel %vm628_vm14, %v1600_v13, %v627_v29  ;;  %v648_v25 = vmul.f32 0.5, %v647_v63  ;;  %v583_v30 = vand.u32 2147483648, %v1612_v19 }
 0x15e   : > { %v674_v59 = vmul.f32 %v1654_v50, %v673_v1  ;;  %v617_v31 = vsel %vm616_vm7, %v1596_v10, %v615_v2  ;;  %v631_v55 = vand.u32 2147483648, %v1600_v13  ;;  %v641_v44 = vsel %vm640_vm6, %v1592_v7, %v639_v62 }
 0x15f   : > { %v663_v34 = vmul.f32 %v662_v5, %v1606_v16  ;;  %v533_v35 = vsel %vm532_vm8, %v1598_v12, %v531_v6  ;;  %v552_v50 = vmul.f32 0.5, %v551_v9  ;;  %v589_v39 = vsub.f32 1.5, %v588_v14  ;;  %v769_v6 = vld [vmem:[%s1496_s7 + $0x18] sm:$0xff] }
 0x160   : > { %vm678_vm5 = vcmp.eq.f32.partialorder %v1614_v20, 0.0  ;;  %1223 = vrsqrt.f32 %v1748_v15  ;;  %v579_v40 = vmul.f32 %v578_v21, %v1612_v19  ;;  %v602_v18 = vmul.f32 %v1670_v60, %v601_v23 }
 0x161   : > { %v632_v45 = vsel %vm630_vm4, %v631_v55, %v629_v38  ;;  %v649_v46 = vsub.f32 1.5, %v648_v25  ;;  %v620_v43 = vsel %vm618_vm9, %v619_v33, %v617_v31  ;;  %v644_v13 = vsel %vm642_vm10, %v643_v32, %v641_v44  ;;  %v770_v38 = vld [vmem:[%s1496_s7 + $0x20] sm:$0xff]  ;;  %v771_v25 = vld [vmem:[%s1496_s7 + $0x28] sm:$0xff]  ;;  %v772_v44 = vld [vmem:[%s1496_s7 + $0x30] sm:$0xff] }
 0x162   : > { %v675_v22 = vmul.f32 %v674_v59, %v1614_v20  ;;  %v1782_v51 = vpop.eup %1221  ;;  %v524_v60 = vsel %vm522_vm11, %v523_v17, %v521_v54  ;;  %v536_v52 = vsel %vm534_vm12, %v535_v4, %v533_v35  ;;  %vm604_vm6 = vcmp.eq.f32.partialorder %v1626_v28, inf  ;;  %v811_v35 = vld [vmem:[%s1504_s27 + $0x28] sm:$0xff] }
 0x163   : > { %v665_v10 = vsel %vm664_vm13, %v1606_v16, %v663_v34  ;;  %v553_v7 = vsub.f32 1.5, %v552_v50  ;;  %v590_v32 = vmul.f32 %v1681_v8, %v589_v39  ;;  %vm606_vm7 = vcmp.eq.f32.partialorder %v1626_v28, 0.0  ;;  %v810_v34 = vld [vmem:[%s1504_s27 + $0x20] sm:$0xff] }
 0x164   : > { %v607_v33 = vand.u32 2147483648, %v1626_v28  ;;  %v706_v53 = vsub.f32 %v536_v52, %v632_v45  ;;  %v581_v3 = vsel %vm580_vm15, %v1612_v19, %v579_v40  ;;  %v603_v12 = vmul.f32 %v602_v18, %v1626_v28  ;;  %v1867_v45 = vld [vmem:[%s1496_s7] sm:$0xff] }
 0x165   : > { %v705_v17 = vsub.f32 %v524_v60, %v620_v43  ;;  %v707_v57 = vsub.f32 %v1715_v47, %v644_v13  ;;  %v650_v26 = vmul.f32 %v1693_v24, %v649_v46  ;;  %v682_v58 = vmul.f32 %v1782_v51, %v1728_v61  ;;  %v1870_v46 = vld [vmem:[%s1496_s7 + $0x40] sm:$0xff]  ;;  %v812_v43 = vld [vmem:[%s1504_s27 + $0x30] sm:$0xff] }
 0x166   : > { %v668_v8 = vsel %vm666_vm1, %v667_v41, %v665_v10  ;;  %v677_v62 = vsel %vm676_vm2, %v1614_v20, %v675_v22  ;;  %v1812_v27 = vpop.eup %1223  ;;  %vm592_vm8 = vcmp.eq.f32.partialorder %v1639_v37, inf  ;;  %vm594_vm9 = vcmp.eq.f32.partialorder %v1639_v37, 0.0  ;;  %v773_v22 = vld [vmem:[%s1496_s7 + $0x38] sm:$0xff] }
 0x167   : > { %v595_v24 = vand.u32 2147483648, %v1639_v37  ;;  %vm652_vm10 = vcmp.eq.f32.partialorder %v1648_v42, inf  ;;  %v554_v47 = vmul.f32 %v1703_v36, %v553_v7  ;;  %v584_v16 = vsel %vm582_vm3, %v583_v30, %v581_v3  ;;  %v809_v30 = vld [vmem:[%s1504_s27 + $0x18] sm:$0xff] }
 0x168   : > { %v591_v41 = vmul.f32 %v590_v32, %v1639_v37  ;;  %v714_v49 = vmul.f32 %v706_v53, %v706_v53  ;;  %v605_v29 = vsel %vm604_vm6, %v1626_v28, %v603_v12  ;;  %vm654_vm11 = vcmp.eq.f32.partialorder %v1648_v42, 0.0 }
 0x169   : > { %v680_v63 = vsel %vm678_vm5, %v679_v56, %v677_v62  ;;  %v709_v36 = vsub.f32 %v1685_v11, %v668_v8  ;;  %v651_v19 = vmul.f32 %v650_v26, %v1648_v42  ;;  %v683_v0 = vmul.f32 %v1782_v51, %v682_v58  ;;  %v774_v26 = vld [vmem:[%s1496_s7 + $0x58] sm:$0xff]  ;;  %v1894_v62 = vld [vmem:[%s1496_s7 + $0xc0] sm:$0xff] }
 0x16a   : > { %v694_v1 = vmul.f32 %v1812_v27, %v1748_v15  ;;  %v713_v54 = vmul.f32 %v705_v17, %v705_v17  ;;  %vm556_vm12 = vcmp.eq.f32.partialorder %v1661_v48, inf  ;;  %vm558_vm13 = vcmp.eq.f32.partialorder %v1661_v48, 0.0  ;;  %v813_v58 = vld [vmem:[%s1504_s27 + $0x38] sm:$0xff] }
 0x16b   : > { %v559_v20 = vand.u32 2147483648, %v1661_v48  ;;  %v710_v56 = vsub.f32 %v584_v16, %v680_v63  ;;  %v555_v11 = vmul.f32 %v554_v47, %v1661_v48  ;;  %v593_v2 = vsel %vm592_vm8, %v1639_v37, %v591_v41  ;;  %v745_v63 = vld [vmem:[%s1504_s27] sm:$0xff] }
 0x16c   : > { %v655_v4 = vand.u32 2147483648, %v1648_v42  ;;  %v722_v5 = vsel %vm303_vm0, %v714_v49, 0.0  ;;  %v1847_v9 = vsel %vm606_vm7, %v607_v33, %v605_v29  ;;  %v691_v14 = vand.u32 2147483648, %v1728_v61 }
 0x16d   : > { %v715_v21 = vmul.f32 %v707_v57, %v707_v57  ;;  %v717_v23 = vmul.f32 %v709_v36, %v709_v36  ;;  %v653_v59 = vsel %vm652_vm10, %v1648_v42, %v651_v19  ;;  %v684_v31 = vmul.f32 0.5, %v683_v0  ;;  %v1884_v57 = vld [vmem:[%s1496_s7 + $0x80] sm:$0xff] }
 0x16e   : > { %v695_v28 = vmul.f32 %v1812_v27, %v694_v1  ;;  %v721_v55 = vsel %vm303_vm0, %v713_v54, 0.0  ;;  %v1863_v50 = vsel %vm594_vm9, %v595_v24, %v593_v2  ;;  %v703_v39 = vand.u32 2147483648, %v1748_v15  ;;  %v775_v24 = vld [vmem:[%s1496_s7 + $0x60] sm:$0xff] }
 0x16f   : > { %v718_v40 = vmul.f32 %v710_v56, %v710_v56  ;;  %v723_v18 = vadd.f32 %v722_v5, %v721_v55  ;;  %v557_v13 = vsel %vm556_vm12, %v1661_v48, %v555_v11  ;;  %v789_v37 = vand.u32 2147483647, %v769_v6  ;;  %v814_v48 = vld [vmem:[%s1504_s27 + $0x58] sm:$0xff]  ;;  %v746_v19 = vld [vmem:[%s1504_s27 + $0x40] sm:$0xff] }
 0x170   : > { %v790_v60 = vand.u32 2147483647, %v770_v38  ;;  %v829_v52 = vand.u32 2147483647, %v809_v30  ;;  %v656_v10 = vsel %vm654_vm11, %v655_v4, %v653_v59  ;;  %v791_v7 = vand.u32 2147483647, %v771_v25 }
 0x171   : > { %v830_v32 = vand.u32 2147483647, %v810_v34  ;;  %v831_v33 = vand.u32 2147483647, %v811_v35  ;;  %v685_v53 = vsub.f32 1.5, %v684_v31  ;;  %v696_v3 = vmul.f32 0.5, %v695_v28 }
 0x172   : > { %v724_v12 = vsel %vm303_vm0, %v715_v21, 0.0  ;;  %v1881_v17 = vsel %vm303_vm0, %v717_v23, 0.0  ;;  %v560_v42 = vsel %vm558_vm13, %v559_v20, %v557_v13  ;;  %v1891_v8 = vsel %vm303_vm0, %v718_v40, 0.0  ;;  %v1905_v0 = vld [vmem:[%s1504_s27 + $0x80] sm:$0xff]  ;;  %v776_v21 = vld [vmem:[%s1496_s7 + $0x68] sm:$0xff]  ;;  %v777_v34 = vld [vmem:[%s1496_s7 + $0x70] sm:$0xff] }
 0x173   : > { %v792_v47 = vand.u32 2147483647, %v772_v44  ;;  %v832_v16 = vand.u32 2147483647, %v812_v43  ;;  %v1897_v41 = vadd.f32 %v724_v12, %v723_v18  ;;  %v741_v49 = vand.u32 2147483647, %v1867_v45 }
 0x174   : > { %v742_v29 = vand.u32 2147483647, %v1870_v46  ;;  %v849_v36 = vsub.f32 %v789_v37, %v829_v52  ;;  %v793_v1 = vand.u32 2147483647, %v773_v22  ;;  %v833_v54 = vand.u32 2147483647, %v813_v58 }
 0x175   : > { %v850_v20 = vsub.f32 %v790_v60, %v830_v32  ;;  %v851_v56 = vsub.f32 %v791_v7, %v831_v33  ;;  %v686_v11 = vmul.f32 %v1782_v51, %v685_v53  ;;  %v697_v2 = vsub.f32 1.5, %v696_v3  ;;  %v1910_v6 = vld [vmem:[%s1504_s27 + $0xc0] sm:$0xff]  ;;  %v816_v38 = vld [vmem:[%s1504_s27 + $0x68] sm:$0xff]  ;;  %v817_v35 = vld [vmem:[%s1504_s27 + $0x70] sm:$0xff] }
 0x176   : > { %v708_v4 = vsub.f32 %v560_v42, %v656_v10  ;;  %v743_v5 = vand.u32 2147483647, %v1884_v57  ;;  %v815_v23 = vld [vmem:[%s1504_s27 + $0x60] sm:$0xff]  ;;  %vm688_vm14 = vcmp.eq.f32.partialorder %v1728_v61, inf  ;;  %v744_v25 = vand.u32 2147483647, %v1894_v62 }
 0x177   : > { %v794_v30 = vand.u32 2147483647, %v774_v26  ;;  %v834_v59 = vand.u32 2147483647, %v814_v48  ;;  %v852_v31 = vsub.f32 %v792_v47, %v832_v16  ;;  %v749_v51 = vand.u32 2147483647, %v745_v63 }
 0x178   : > { %v750_v28 = vand.u32 2147483647, %v746_v19  ;;  %v795_v55 = vand.u32 2147483647, %v775_v24  ;;  %v869_v44 = vmul.f32 %v849_v36, %v849_v36  ;;  %v835_v40 = vand.u32 2147483647, %v815_v23 }
 0x179   : > { %v853_v18 = vsub.f32 %v793_v1, %v833_v54  ;;  %v870_v45 = vmul.f32 %v850_v20, %v850_v20  ;;  %v871_v46 = vmul.f32 %v851_v56, %v851_v56  ;;  %v687_v43 = vmul.f32 %v686_v11, %v1728_v61  ;;  %v778_v60 = vld [vmem:[%s1496_s7 + $0x78] sm:$0xff] }
 0x17a   : > { %v698_v13 = vmul.f32 %v1812_v27, %v697_v2  ;;  %v751_v22 = vand.u32 2147483647, %v1905_v0  ;;  %v752_v37 = vand.u32 2147483647, %v1910_v6  ;;  %vm690_vm15 = vcmp.eq.f32.partialorder %v1728_v61, 0.0  ;;  %v818_v3 = vld [vmem:[%s1504_s27 + $0x78] sm:$0xff] }
 0x17b   : > { %v796_v52 = vand.u32 2147483647, %v776_v21  ;;  %v836_v10 = vand.u32 2147483647, %v816_v38  ;;  %v854_v7 = vsub.f32 %v794_v30, %v834_v59  ;;  %v872_v32 = vmul.f32 %v852_v31, %v852_v31  ;;  %v779_v27 = vld [vmem:[%s1496_s7 + $0x98] sm:$0xff]  ;;  %v780_v0 = vld [vmem:[%s1496_s7 + $0xa0] sm:$0xff] }
 0x17c   : > { %v716_v33 = vmul.f32 %v708_v4, %v708_v4  ;;  %v797_v53 = vand.u32 2147483647, %v777_v34  ;;  %v837_v12 = vand.u32 2147483647, %v817_v35  ;;  %v889_v26 = vsel %vm303_vm0, %v869_v44, 0.0  ;;  %v819_v36 = vld [vmem:[%s1504_s27 + $0x98] sm:$0xff] }
 0x17d   : > { %vm700_vm1 = vcmp.eq.f32.partialorder %v1748_v15, inf  ;;  %v855_v58 = vsub.f32 %v795_v55, %v835_v40  ;;  %v873_v42 = vmul.f32 %v853_v18, %v853_v18  ;;  %v890_v24 = vsel %vm303_vm0, %v870_v45, 0.0  ;;  %v820_v4 = vld [vmem:[%s1504_s27 + $0xa0] sm:$0xff]  ;;  %v781_v6 = vld [vmem:[%s1496_s7 + $0xa8] sm:$0xff]  ;;  %v782_v44 = vld [vmem:[%s1496_s7 + $0xb0] sm:$0xff] }
 0x17e   : > { %v892_v47 = vsel %vm303_vm0, %v871_v46, 0.0  ;;  %v753_v16 = vsub.f32 %v741_v49, %v749_v51  ;;  %v754_v63 = vsub.f32 %v742_v29, %v750_v28  ;;  %v798_v48 = vand.u32 2147483647, %v778_v60  ;;  %v821_v28 = vld [vmem:[%s1504_s27 + $0xa8] sm:$0xff] }
 0x17f   : > { %v891_v19 = vadd.f32 %v890_v24, %v889_v26  ;;  %v838_v1 = vand.u32 2147483647, %v818_v3  ;;  %v856_v54 = vsub.f32 %v796_v52, %v836_v10  ;;  %v874_v20 = vmul.f32 %v854_v7, %v854_v7  ;;  %v824_v24 = vld [vmem:[%s1504_s27 + $0xd8] sm:$0xff] }
 0x180   : > { %v894_v56 = vsel %vm303_vm0, %v872_v32, 0.0  ;;  %v689_v11 = vsel %vm688_vm14, %v1728_v61, %v687_v43  ;;  %v726_v2 = vsel %vm303_vm0, %v716_v33, 0.0  ;;  %v799_v49 = vand.u32 2147483647, %v779_v27  ;;  %v784_v33 = vld [vmem:[%s1496_s7 + $0xd8] sm:$0xff] }
 0x181   : > { %v893_v29 = vadd.f32 %v892_v47, %v891_v19  ;;  %vm702_vm2 = vcmp.eq.f32.partialorder %v1748_v15, 0.0  ;;  %v839_v21 = vand.u32 2147483647, %v819_v36  ;;  %v857_v23 = vsub.f32 %v797_v53, %v837_v12 }
 0x182   : > { %v875_v38 = vmul.f32 %v855_v58, %v855_v58  ;;  %v896_v30 = vsel %vm303_vm0, %v873_v42, 0.0  ;;  %v699_v59 = vmul.f32 %v698_v13, %v1748_v15  ;;  %v755_v31 = vsub.f32 %v743_v5, %v751_v22  ;;  %v822_v5 = vld [vmem:[%s1504_s27 + $0xb0] sm:$0xff]  ;;  %v783_v13 = vld [vmem:[%s1496_s7 + $0xb8] sm:$0xff] }
 0x183   : > { %v800_v51 = vand.u32 2147483647, %v780_v0  ;;  %v895_v55 = vadd.f32 %v894_v56, %v893_v29  ;;  %v840_v34 = vand.u32 2147483647, %v820_v4  ;;  %v858_v35 = vsub.f32 %v798_v48, %v838_v1  ;;  %v785_v48 = vld [vmem:[%s1496_s7 + $0xe0] sm:$0xff] }
 0x184   : > { %v876_v40 = vmul.f32 %v856_v54, %v856_v54  ;;  %v898_v18 = vsel %vm303_vm0, %v874_v20, 0.0  ;;  %v692_v45 = vsel %vm690_vm15, %v691_v14, %v689_v11  ;;  %v727_v46 = vadd.f32 %v726_v2, %v1897_v41  ;;  %v823_v41 = vld [vmem:[%s1504_s27 + $0xb8] sm:$0xff]  ;;  %v786_v54 = vld [vmem:[%s1496_s7 + $0xe8] sm:$0xff] }
 0x185   : > { %v801_v57 = vand.u32 2147483647, %v781_v6  ;;  %v897_v43 = vadd.f32 %v896_v30, %v895_v55  ;;  %v841_v22 = vand.u32 2147483647, %v821_v28  ;;  %v859_v60 = vsub.f32 %v799_v49, %v839_v21  ;;  %v826_v6 = vld [vmem:[%s1504_s27 + $0xe8] sm:$0xff]  ;;  %v787_v21 = vld [vmem:[%s1496_s7 + $0xf0] sm:$0xff] }
 0x186   : > { %v877_v52 = vmul.f32 %v857_v23, %v857_v23  ;;  %v900_v10 = vsel %vm303_vm0, %v875_v38, 0.0  ;;  %v701_v7 = vsel %vm700_vm1, %v1748_v15, %v699_v59  ;;  %v756_v61 = vsub.f32 %v744_v25, %v752_v37  ;;  %v827_v28 = vld [vmem:[%s1504_s27 + $0xf0] sm:$0xff] }
 0x187   : > { %v802_v14 = vand.u32 2147483647, %v782_v44  ;;  %v899_v32 = vadd.f32 %v898_v18, %v897_v43  ;;  %v842_v53 = vand.u32 2147483647, %v822_v5  ;;  %v860_v3 = vsub.f32 %v800_v51, %v840_v34  ;;  %v788_v44 = vld [vmem:[%s1496_s7 + $0xf8] sm:$0xff] }
 0x188   : > { %v878_v12 = vmul.f32 %v858_v35, %v858_v35  ;;  %v902_v26 = vsel %vm303_vm0, %v876_v40, 0.0  ;;  %v711_v27 = vsub.f32 %v1863_v50, %v692_v45  ;;  %v757_v58 = vmul.f32 %v753_v16, %v753_v16  ;;  %v825_v50 = vld [vmem:[%s1504_s27 + $0xe0] sm:$0xff] }
 0x189   : > { %v803_v42 = vand.u32 2147483647, %v783_v13  ;;  %v901_v47 = vadd.f32 %v900_v10, %v899_v32  ;;  %v843_v62 = vand.u32 2147483647, %v823_v41  ;;  %v861_v25 = vsub.f32 %v801_v57, %v841_v22 }
 0x18a   : > { %v879_v37 = vmul.f32 %v859_v60, %v859_v60  ;;  %v904_v36 = vsel %vm303_vm0, %v877_v52, 0.0  ;;  %v704_v19 = vsel %vm702_vm2, %v703_v39, %v701_v7  ;;  %v758_v0 = vmul.f32 %v754_v63, %v754_v63 }
 0x18b   : > { %v804_v1 = vand.u32 2147483647, %v784_v33  ;;  %v903_v16 = vadd.f32 %v902_v26, %v901_v47  ;;  %v844_v20 = vand.u32 2147483647, %v824_v24  ;;  %v862_v56 = vsub.f32 %v802_v14, %v842_v53 }
 0x18c   : > { %v880_v11 = vmul.f32 %v860_v3, %v860_v3  ;;  %v906_v2 = vsel %vm303_vm0, %v878_v12, 0.0  ;;  %v729_v49 = vadd.f32 %v1881_v17, %v727_v46  ;;  %v759_v4 = vmul.f32 %v755_v31, %v755_v31  ;;  %v828_v46 = vld [vmem:[%s1504_s27 + $0xf8] sm:$0xff] }
 0x18d   : > { %v805_v29 = vand.u32 2147483647, %v785_v48  ;;  %v905_v15 = vadd.f32 %v904_v36, %v903_v16  ;;  %v845_v39 = vand.u32 2147483647, %v825_v50  ;;  %v863_v63 = vsub.f32 %v803_v42, %v843_v62 }
 0x18e   : > { %v881_v23 = vmul.f32 %v861_v25, %v861_v25  ;;  %v908_v38 = vsel %vm303_vm0, %v879_v37, 0.0  ;;  %v712_v30 = vsub.f32 %v1847_v9, %v704_v19  ;;  %v761_v59 = vsel %vm303_vm0, %v757_v58, 0.0 }
 0x18f   : > { %v806_v51 = vand.u32 2147483647, %v786_v54  ;;  %v907_v55 = vadd.f32 %v906_v2, %v905_v15  ;;  %v846_v17 = vand.u32 2147483647, %v826_v6  ;;  %v864_v31 = vsub.f32 %v804_v1, %v844_v20 }
 0x190   : > { %v882_v34 = vmul.f32 %v862_v56, %v862_v56  ;;  %v910_v35 = vsel %vm303_vm0, %v880_v11, 0.0  ;;  %v719_v40 = vmul.f32 %v711_v27, %v711_v27  ;;  %v762_v18 = vsel %vm303_vm0, %v758_v0, 0.0 }
 0x191   : > { %v807_v45 = vand.u32 2147483647, %v787_v21  ;;  %v909_v57 = vadd.f32 %v908_v38, %v907_v55  ;;  %v847_v5 = vand.u32 2147483647, %v827_v28  ;;  %v865_v43 = vsub.f32 %v805_v29, %v845_v39 }
 0x192   : > { %v883_v9 = vmul.f32 %v863_v63, %v863_v63  ;;  %v912_v13 = vsel %vm303_vm0, %v881_v23, 0.0  ;;  %v760_v22 = vmul.f32 %v756_v61, %v756_v61  ;;  %v764_v60 = vsel %vm303_vm0, %v759_v4, 0.0 }
 0x193   : > { %v808_v52 = vand.u32 2147483647, %v788_v44  ;;  %v911_v10 = vadd.f32 %v910_v35, %v909_v57  ;;  %v848_v7 = vand.u32 2147483647, %v828_v46  ;;  %v866_v14 = vsub.f32 %v806_v51, %v846_v17 }
 0x194   : > { %v884_v41 = vmul.f32 %v864_v31, %v864_v31  ;;  %v914_v32 = vsel %vm303_vm0, %v882_v34, 0.0  ;;  %v720_v33 = vmul.f32 %v712_v30, %v712_v30  ;;  %v731_v53 = vadd.f32 %v1891_v8, %v729_v49 }
 0x195   : > { %v763_v3 = vadd.f32 %v762_v18, %v761_v59  ;;  %v913_v12 = vadd.f32 %v912_v13, %v911_v10  ;;  %v732_v26 = vsel %vm303_vm0, %v719_v40, 0.0  ;;  %v867_v27 = vsub.f32 %v807_v45, %v847_v5 }
 0x196   : > { %v885_v58 = vmul.f32 %v865_v43, %v865_v43  ;;  %v916_v61 = vsel %vm303_vm0, %v883_v9, 0.0  ;;  %v868_v24 = vsub.f32 %v808_v52, %v848_v7  ;;  %v886_v47 = vmul.f32 %v866_v14, %v866_v14 }
 0x197   : > { %v915_v42 = vadd.f32 %v914_v32, %v913_v12  ;;  %v918_v48 = vsel %vm303_vm0, %v884_v41, 0.0  ;;  %v733_v62 = vadd.f32 %v732_v26, %v731_v53  ;;  %v765_v25 = vadd.f32 %v764_v60, %v763_v3 }
 0x198   : > { %v734_v36 = vsel %vm303_vm0, %v720_v33, 0.0  ;;  %v766_v8 = vsel %vm303_vm0, %v760_v22, 0.0  ;;  %v887_v19 = vmul.f32 %v867_v27, %v867_v27  ;;  %v920_v0 = vsel %vm303_vm0, %v885_v58, 0.0 }
 0x199   : > { %v917_v37 = vadd.f32 %v916_v61, %v915_v42  ;;  %v888_v50 = vmul.f32 %v868_v24, %v868_v24  ;;  %v922_v16 = vsel %vm303_vm0, %v886_v47, 0.0  ;;  %v735_v54 = vadd.f32 %v734_v36, %v733_v62 }
 0x19a   : > { %v767_v20 = vadd.f32 %v766_v8, %v765_v25  ;;  %v924_v11 = vsel %vm303_vm0, %v887_v19, 0.0  ;;  %vm941_vm3 = vcmask 0  }
 0x19b   : > { %v919_v1 = vadd.f32 %v918_v48, %v917_v37  ;;  %v926_v49 = vsel %vm303_vm0, %v888_v50, 0.0 }
 0x19c   : > { %v768_v4 = vadd.f32 %v767_v20, %v735_v54 }
 0x19d   : > { %v921_v56 = vadd.f32 %v920_v0, %v919_v1 }
 0x19f   : > { %v923_v2 = vadd.f32 %v922_v16, %v921_v56 }
 0x1a1   : > { %v925_v29 = vadd.f32 %v924_v11, %v923_v2 }
 0x1a3   : > { %v927_v6 = vadd.f32 %v926_v49, %v925_v29 }
 0x1a5   : > { %v928_v15 = vadd.f32 %v927_v6, %v768_v4 }
 0x1a7   : > { %v929_v21 = vsel %vm303_vm0, %v928_v15, 0.0 }
 0x1a8   : > { %930 = vadd.xlane.f32.xlu1 %v929_v21 }
 0x21b   : > { %v931_v39 = vpop.xlane.xlu1 %930 }
 0x21c   : > { %v932_v63 = vrot.slane %v931_v39, 4 }
 0x21e   : > { %v933_v23 = vadd.f32 %v932_v63, %v931_v39 }
 0x220   : > { %v934_v38 = vrot.slane %v933_v23, 2 }
 0x222   : > { %v935_v30 = vadd.f32 %v934_v38, %v933_v23 }
 0x224   : > { %v936_v59 = vrot.slane %v935_v30, 1 }
 0x226   : > { %v937_v51 = vadd.f32 %v936_v59, %v935_v30 }
 0x228   : > { %1117 = vpush %v937_v51 }
 0x259   : > { %s1118_s22 = spop %1117 }
 0x25a   : > { %v940_v28 = vstv %s1118_s22 }
 0x25b   : > { %942 = vst.msk [vmem:[%s278_s21] sm:$0x1] %vm941_vm3, %v940_v28 }
 0x25c PF: > { %s19_s17 = sadd.s32 1, %s1373_s17   ;;  %s2041_s12 = smov %s1357_s13 }
 0x25d   : > { %p16_p2 = scmp.ge.s32.totalorder %s19_s17, 4   ;;  %s2042_s13 = smov %s1361_s14 }
 0x25e   : > { %s2043_s14 = smov %s1474_s9  ;;  %s2044_s15 = smov %s1369_s16 }
 0x25f   : > { %s2045_s16 = smov %s2047_s29  ;;  %18 = sbr.rel (!%p16_p2) target bundleno = 8 (0x8), region = 89 }
 0x264   :  { %966 = vsyncpa [#allocation3], 1 }
 0x265   :  { %968 = vsyncpa [#allocation3 + $0x1], 1 }
 0x266   :  { %969 = vsyncpa [#allocation5], 1 }
 0x267   :  { %971 = vsyncpa [#allocation5 + $0x1], 1 }

</bundles_post_ra>
